<compile_context>
chip_gen: v6e
topology: v6e:2x2x1
jax: 0.10.0
libtpu: 0.0.40
codegen_flags: <defaults>
</compile_context>

<pallas_src>
import math

import jax
import jax.numpy as jnp
from jax import lax
from jax.experimental import pallas as pl
from jax.experimental.pallas import tpu as pltpu


def _round_up(x, m):
    return (x + m - 1) // m * m


def _sublane(dtype):
    # minimum sublane multiple for second-to-last block dims
    return {4: 8, 2: 16, 1: 32}.get(jnp.dtype(dtype).itemsize, 8)


def _bilinear_kernel(t1_ref, w_ref, t2_ref, out_ref, inter_ref):
    # Block shapes (batch dim squeezed away via None in the BlockSpecs):
    #   t1_ref: (TM, D1), w_ref: (D1, D2), t2_ref: (TN, D2),
    #   out_ref: (TM, TN), inter_ref (VMEM scratch): (TM, D2) f32.
    # Grid = (B, S1-tiles, S2-tiles); the S2 axis is innermost ("arbitrary"),
    # so t1 @ W is computed once per (b, i) tile and reused for every S2 tile.
    @pl.when(pl.program_id(2) == 0)
    def _():
        inter_ref[...] = jnp.dot(
            t1_ref[...], w_ref[...], preferred_element_type=jnp.float32
        )

    # Cast the intermediate back to the input dtype (identity for f32, keeps
    # bf16 inputs on the fast bf16 MXU path) and contract directly against
    # tensor_2's feature dim -- no explicit .T / XLU transpose.
    inter = inter_ref[...].astype(t2_ref.dtype)
    acc = lax.dot_general(
        inter,
        t2_ref[...],
        dimension_numbers=(((1,), (1,)), ((), ())),
        preferred_element_type=jnp.float32,
    )
    out_ref[...] = acc.astype(out_ref.dtype)


def bilinear_similarity(tensor_1, tensor_2, weight_matrix, *, tile_m=256, tile_n=256):
    """result[b, i, j] = tensor_1[b, i, :] @ W @ tensor_2[b, j, :]  (bias/act = defaults)."""
    B, S1, D1 = tensor_1.shape
    B2, S2, D2 = tensor_2.shape
    assert B == B2, "batch dims must match"
    assert weight_matrix.shape == (D1, D2)

    out_dtype = tensor_1.dtype
    sub = _sublane(out_dtype)

    # Tile sizes: sublane-aligned TM, lane-dense output (TN multiple of 128).
    # 256-tiles keep the MXU fed and stay well under the scoped-VMEM budget on
    # v5e/v6e/v7x with double buffering.
    TM = min(tile_m, _round_up(S1, sub))
    TN = min(tile_n, _round_up(S2, 128))

    S1p = _round_up(S1, TM)
    S2p = _round_up(S2, TN)
    if S1p != S1:
        tensor_1 = jnp.pad(tensor_1, ((0, 0), (0, S1p - S1), (0, 0)))
    if S2p != S2:
        tensor_2 = jnp.pad(tensor_2, ((0, 0), (0, S2p - S2), (0, 0)))

    grid = (B, S1p // TM, S2p // TN)

    itemsize = jnp.dtype(out_dtype).itemsize
    flops = 2 * B * S1p * D1 * D2 + 2 * B * S1p * S2p * D2
    bytes_accessed = (
        B * S1p * D1 * itemsize
        + B * S2p * D2 * itemsize * (S1p // TM)
        + D1 * D2 * jnp.dtype(weight_matrix.dtype).itemsize
        + B * S1p * S2p * itemsize
    )

    out = pl.pallas_call(
        _bilinear_kernel,
        out_shape=jax.ShapeDtypeStruct((B, S1p, S2p), out_dtype),
        grid_spec=pltpu.PrefetchScalarGridSpec(
            num_scalar_prefetch=0,
            grid=grid,
            in_specs=[
                # batch dim squeezed (None); one (TM, D1) tile of tensor_1
                pl.BlockSpec((None, TM, D1), lambda b, i, j: (b, i, 0)),
                # full weight, resident across the whole grid (constant index_map)
                pl.BlockSpec((D1, D2), lambda b, i, j: (0, 0)),
                # one (TN, D2) tile of tensor_2
                pl.BlockSpec((None, TN, D2), lambda b, i, j: (b, j, 0)),
            ],
            out_specs=pl.BlockSpec((None, TM, TN), lambda b, i, j: (b, i, j)),
            scratch_shapes=[pltpu.VMEM((TM, D2), jnp.float32)],
        ),
        compiler_params=pltpu.CompilerParams(
            # batch & S1-tile axes are megacore-shardable (v7x 2 TCs);
            # the S2 axis carries the inter-scratch reuse -> keep "arbitrary".
            dimension_semantics=("parallel", "parallel", "arbitrary"),
            vmem_limit_bytes=32 * 1024 * 1024,
        ),
        cost_estimate=pl.CostEstimate(
            flops=int(flops), transcendentals=0, bytes_accessed=int(bytes_accessed)
        ),
    )(tensor_1, weight_matrix, tensor_2)

    if S1p != S1 or S2p != S2:
        out = out[:, :S1, :S2]
    return out


def make_weight(key, tensor_1_dim, tensor_2_dim, dtype=jnp.float32):
    """Deterministic xavier_uniform_ equivalent: U(-a, a), a = sqrt(6/(fan_in+fan_out))."""
    bound = math.sqrt(6.0 / (tensor_1_dim + tensor_2_dim))
    return jax.random.uniform(
        key, (tensor_1_dim, tensor_2_dim), dtype=dtype, minval=-bound, maxval=bound
    )


if __name__ == "__main__":
    key = jax.random.PRNGKey(0)
    k1, k2, kw, k3, k4, kw2 = jax.random.split(key, 6)

    # Small demo shapes consistent with the module (batch, seq, hidden).
    B, S1, S2, D1, D2 = 2, 8, 8, 32, 32
    tensor_1 = jax.random.normal(k1, (B, S1, D1), dtype=jnp.float32)
    tensor_2 = jax.random.normal(k2, (B, S2, D2), dtype=jnp.float32)
    weight = make_weight(kw, D1, D2)

    out = jax.block_until_ready(bilinear_similarity(tensor_1, tensor_2, weight))
    ref = jnp.einsum("bsd,de,bte->bst", tensor_1, weight, tensor_2)
    assert out.shape == (B, S1, S2)
    assert jnp.allclose(out, ref, atol=1e-3, rtol=1e-3)

    # Second check exercising the tiled / padded path (multiple S2 tiles, so
    # the t1 @ W scratch is actually reused across grid steps).
    B, S1, S2, D1, D2 = 2, 40, 300, 64, 96
    t1b = jax.random.normal(k3, (B, S1, D1), dtype=jnp.float32)
    t2b = jax.random.normal(k4, (B, S2, D2), dtype=jnp.float32)
    wb = make_weight(kw2, D1, D2)
    out2 = jax.block_until_ready(bilinear_similarity(t1b, t2b, wb))
    ref2 = jnp.einsum("bsd,de,bte->bst", t1b, wb, t2b)
    assert out2.shape == (B, S1, S2)
    assert jnp.allclose(out2, ref2, atol=1e-2, rtol=1e-2)

    print("KERNEL_OK")
</pallas_src>

<mosaic_0001>
module attributes {stable_mosaic.version = 11 : i64} {
  func.func @_bilinear_kernel(%arg0: i32, %arg1: i32, %arg2: i32, %arg3: memref<1x8x32xf32, #tpu.memory_space<vmem>>, %arg4: memref<32x32xf32, #tpu.memory_space<vmem>>, %arg5: memref<1x128x32xf32, #tpu.memory_space<vmem>>, %arg6: memref<1x8x128xf32, #tpu.memory_space<vmem>>, %arg7: memref<8x32xf32, #tpu.memory_space<vmem>>) attributes {dimension_semantics = [#tpu.dimension_semantics<parallel>, #tpu.dimension_semantics<parallel>, #tpu.dimension_semantics<arbitrary>], iteration_bounds = array<i64: 2, 1, 1>, scalar_prefetch = 0 : i64, scratch_operands = 1 : i64, tpu.core_type = #tpu.core_type<tc>, window_params = [{transform_indices = @transform_0, window_bounds = array<i64: 1, 8, 32>}, {pipeline_mode = #tpu.pipeline_mode<synchronous>, transform_indices = @transform_1, window_bounds = array<i64: 32, 32>}, {transform_indices = @transform_2, window_bounds = array<i64: 1, 128, 32>}, {transform_indices = @transform_3, window_bounds = array<i64: 1, 8, 128>}]} {
    %c0_i32 = arith.constant 0 : i32
    %0 = arith.cmpi eq, %arg2, %c0_i32 : i32
    %1 = arith.extui %0 : i1 to i32
    %c0_i32_0 = arith.constant 0 : i32
    %2 = arith.cmpi ne, %1, %c0_i32_0 : i32
    scf.if %2 {
      %c0_8 = arith.constant 0 : index
      %c0_9 = arith.constant 0 : index
      %c0_10 = arith.constant 0 : index
      %10 = vector.load %arg3[%c0_8, %c0_9, %c0_10] : memref<1x8x32xf32, #tpu.memory_space<vmem>>, vector<1x8x32xf32>
      %11 = vector.shape_cast %10 : vector<1x8x32xf32> to vector<8x32xf32>
      %c0_11 = arith.constant 0 : index
      %c0_12 = arith.constant 0 : index
      %12 = vector.load %arg4[%c0_11, %c0_12] : memref<32x32xf32, #tpu.memory_space<vmem>>, vector<32x32xf32>
      %cst_13 = arith.constant dense<0.000000e+00> : vector<8x32xf32>
      %13 = tpu.matmul %11, %12, %cst_13 {dimension_numbers = #tpu.dot_dimension_numbers<[1], [0], [0], [1], [0, 0, 1, 1], [], []>} : vector<8x32xf32>, vector<32x32xf32>, vector<8x32xf32> -> vector<8x32xf32>
      %c0_14 = arith.constant 0 : index
      %c0_15 = arith.constant 0 : index
      %14 = vector.load %arg7[%c0_14, %c0_15] : memref<8x32xf32, #tpu.memory_space<vmem>>, vector<8x32xf32>
      tpu.vector_store %arg7[%c0_14, %c0_15], %13 {strides = array<i32>} : memref<8x32xf32, #tpu.memory_space<vmem>>, vector<8x32xf32>,
    } else {
    }
    %c0 = arith.constant 0 : index
    %c0_1 = arith.constant 0 : index
    %3 = vector.load %arg7[%c0, %c0_1] : memref<8x32xf32, #tpu.memory_space<vmem>>, vector<8x32xf32>
    %c0_2 = arith.constant 0 : index
    %c0_3 = arith.constant 0 : index
    %c0_4 = arith.constant 0 : index
    %4 = vector.load %arg5[%c0_2, %c0_3, %c0_4] : memref<1x128x32xf32, #tpu.memory_space<vmem>>, vector<1x128x32xf32>
    %5 = vector.shape_cast %4 : vector<1x128x32xf32> to vector<128x32xf32>
    %cst = arith.constant dense<0.000000e+00> : vector<8x128xf32>
    %6 = tpu.matmul %3, %5, %cst {dimension_numbers = #tpu.dot_dimension_numbers<[1], [1], [0], [0], [0, 0, 1, 0], [], []>} : vector<8x32xf32>, vector<128x32xf32>, vector<8x128xf32> -> vector<8x128xf32>
    %c0_5 = arith.constant 0 : index
    %c0_6 = arith.constant 0 : index
    %c0_7 = arith.constant 0 : index
    %7 = vector.load %arg6[%c0_5, %c0_6, %c0_7] : memref<1x8x128xf32, #tpu.memory_space<vmem>>, vector<1x8x128xf32>
    %8 = vector.shape_cast %7 : vector<1x8x128xf32> to vector<8x128xf32>
    %9 = vector.shape_cast %6 : vector<8x128xf32> to vector<1x8x128xf32>
    tpu.vector_store %arg6[%c0_5, %c0_6, %c0_7], %9 {strides = array<i32>} : memref<1x8x128xf32, #tpu.memory_space<vmem>>, vector<1x8x128xf32>,
    return
  }
  func.func @transform_0(%arg0: i32, %arg1: i32, %arg2: i32) -> (i32, i32, i32) {
    %c0_i32 = arith.constant 0 : i32
    %c0_i32_0 = arith.constant 0 : i32
    return %arg0, %arg1, %c0_i32 : i32, i32, i32
  }
  func.func @transform_1(%arg0: i32, %arg1: i32, %arg2: i32) -> (i32, i32) {
    %c0_i32 = arith.constant 0 : i32
    %c0_i32_0 = arith.constant 0 : i32
    %c0_i32_1 = arith.constant 0 : i32
    return %c0_i32, %c0_i32_0 : i32, i32
  }
  func.func @transform_2(%arg0: i32, %arg1: i32, %arg2: i32) -> (i32, i32, i32) {
    %c0_i32 = arith.constant 0 : i32
    %c0_i32_0 = arith.constant 0 : i32
    return %arg0, %arg2, %c0_i32 : i32, i32, i32
  }
  func.func @transform_3(%arg0: i32, %arg1: i32, %arg2: i32) -> (i32, i32, i32) {
    %c0_i32 = arith.constant 0 : i32
    return %arg0, %arg1, %arg2 : i32, i32, i32
  }
}

</mosaic_0001>

<bundles_post_ra>
// kernel: tpu_custom_call.1
= control target key start
LH: loop header
LB: loop body
LE: loop exit
PB: predicated region body
PF: predicated region fallthrough
CT: control target
= control target key end

     0   :  { %8 = vsyncpa [#allocation4], 0  ;;  %s1012_s0 = inlined_call_operand.vmem [shape: f32[2,8,32], index: 0, kind: input, shape index: {}]   ;;  %s1013_s1 = inlined_call_operand.vmem [shape: f32[32,32], index: 1, kind: input, shape index: {}]   ;;  %s1014_s2 = inlined_call_operand.vmem [shape: f32[2,128,32], index: 2, kind: input, shape index: {}]   ;;  %s1015_s3 = inlined_call_operand.hbm [shape: f32[2,8,128], index: 3, kind: output, shape index: {}]  }
   0x1   :  { %10 = vsyncpa [#allocation4 + $0x1], 0  ;;  %s827_s12 = smov 0   ;;  %s829_s13 = smov 0  }
   0x2   :  { %s831_s14 = smov 0   ;;  %s833_s15 = smov 0  }
   0x3   :  { %s835_s16 = smov 0   ;;  %s837_s17 = smov 0  }
   0x4 LB: > { %s569_s18 = sadd.s32 4294967295, %s802_s17   ;;  %s570_s19 = sadd.s32 4294967294, %s802_s17   ;;  %s802_s17 = sphi %s837_s17, %s16_s17   ;;  %s798_s16 = sphi %s835_s16, %s1022_s16   ;;  %s794_s15 = sphi %s833_s15, %s1021_s15   ;;  %s790_s14 = sphi %s831_s14, %s1020_s14   ;;  %s786_s13 = sphi %s829_s13, %s1019_s13   ;;  %s782_s12 = sphi %s827_s12, %s1018_s12  }
   0x5   : > { %s35_s20 = sadd.s32 1, %s798_s16  ;;  %s123_s21 = sadd.s32 1, %s790_s14 }
   0x6   : > { %p37_p0 = scmp.ge.s32.totalorder %s35_s20, 2  ;;  %p133_p1 = scmp.ne.s32.totalorder %s790_s14, %s786_s13 }
   0x7   : > { %p134_p2 = scmp.eq.s32.totalorder %s569_s18, 1  ;;  %p139_p3 = scmp.ne.s32.totalorder %s786_s13, %s782_s12 }
   0x8   : > { %s1024_s20 = smov (%p37_p0, %s35_s20), 0  ;;  %p140_p5 = scmp.eq.s32.totalorder %s570_s19, 1 }
   0x9   : > { %p867_p4 = por %p134_p2, %p133_p1  ;;  %s116_s23 = ssub.s32 %s798_s16, %s1024_s20 }
   0xa   : > { %p573_p6 = scmp.ge.s32.totalorder %s802_s17, 1  ;;  %p121_p7 = scmp.eq.s32.totalorder %s116_s23, 0 }
   0xb   : > { %p874_p8 = por %p140_p5, %p139_p3  ;;  %p184_p9 = scmp.lt.s32.totalorder %s802_s17, 3 }
   0xc   : > { %s880_s25 = scalar_select %p121_p7, %s790_s14, %s123_s21  }
   0xd   : > { %p185_p10 = pnand %p573_p6, %p184_p9 }
   0xe   : > { %p219_p11 = scmp.lt.s32.totalorder (!%p185_p10), %s794_s15, 1  ;;  %s216_s26 = sand.u32 (!%p185_p10), 1, %s786_s13  }
   0xf   : > { %188 = sbr.rel (%p185_p10) target bundleno = 437 (0x1b5), region = 32  ;;  %s574_s27 = sshll.u32 (!%p185_p10), %s216_s26, 3 }
  0x10   : > { %s218_s28 = scalar_lea.vmem (!%p185_p10), [#allocation3], %s574_s27 }
  0x11   : > { %s476_s29 = sshll.u32 (!%p185_p10), %s218_s28, 4  ;;  %s963_s29 = int_to_ptr.vmem [resolvable:$true] %s476_s29 }
  0x12   : > { %s726_s8 = scalar_lea.vmem (!%p185_p10), %s963_s29, 128 }
  0x13   : > { %p727_p12 = scmp.ne.s32.totalorder (!%p185_p10), %s963_s29, %s726_s8 }
  0x14   : > { %v244_v0 = vld [vmem:[%s1013_s1 + $0x18] sm:$0xff]  ;;  %v804_v1 = vmov 0.0   ;;  %v243_v2 = vld [vmem:[%s1013_s1 + $0x10] sm:$0xff]  ;;  %vm805_vm0 = vmmov 0   ;;  %s220_s30 = scalar_select %p219_p11, %s794_s15, 1  ;;  %v242_v3 = vld [vmem:[%s1013_s1 + $0x8] sm:$0xff] }
  0x15   : > { %623 = vmatprep.subr.mxu0 %v804_v1  ;;  %631 = vmatprep.mubr.msk.f32.mxu0 %vm805_vm0, %v804_v1  ;;  %v241_v4 = vld [vmem:[%s1013_s1] sm:$0xff]  ;;  %vm245_vm1 = vcmask 261120   ;;  %p728_p13 = pnand %p727_p12, %p867_p4 }
  0x16   : > { %624 = vmatpush3.msra.mxu0 %v244_v0  ;;  %634 = vmatprep.subr.mxu1 %v804_v1  ;;  %s575_s6 = sshll.u32 %s220_s30, 3  ;;  %s600_s7 = sshll.u32 %s220_s30, 7 }
  0x17   : > { %625 = vmatprep.subr.mxu0 %v804_v1  ;;  %666 = vmatprep.mubr.msk.f32.mxu1 %vm805_vm0, %v804_v1  ;;  %s225_s18 = scalar_lea.vmem %s1012_s0, %s575_s6  ;;  %s908_s23 = scalar_lea.vmem %s1014_s2, %s600_s7 }
  0x18   : > { %626 = vmatpush3.msra.mxu0 %v243_v2  ;;  %v240_v5 = vld [vmem:[%s225_s18] sm:$0xff]  ;;  %v336_v6 = vld [vmem:[%s908_s23 + $0x78] sm:$0xff]  ;;  %v335_v7 = vld [vmem:[%s908_s23 + $0x70] sm:$0xff]  ;;  %s597_s30 = sshll.u32 %s794_s15, 7  ;;  %s461_s7 = scalar_lea.sflag [#allocation4], %s216_s26 }
  0x19   : > { %627 = vmatprep.subr.mxu0 %v804_v1  ;;  %635 = vmatpush3.xpose.msk.msra.mxu1 %vm245_vm1, %v336_v6  ;;  %v334_v8 = vld [vmem:[%s908_s23 + $0x68] sm:$0xff]  ;;  %v333_v9 = vld [vmem:[%s908_s23 + $0x60] sm:$0xff]  ;;  %v332_v10 = vld [vmem:[%s908_s23 + $0x58] sm:$0xff]  ;;  %s968_s6 = scalar_lea.hbm %s1015_s3, %s597_s30  ;;  %p729_p0 = pneg %p728_p13 }
  0x1a   : > { %628 = vmatpush3.msra.mxu0 %v242_v3  ;;  %636 = vmatprep.subr.mxu1 %v804_v1  ;;  %v331_v11 = vld [vmem:[%s908_s23 + $0x50] sm:$0xff]  ;;  %v330_v12 = vld [vmem:[%s908_s23 + $0x48] sm:$0xff]  ;;  %v329_v13 = vld [vmem:[%s908_s23 + $0x40] sm:$0xff]  ;;  %s806_s15 = smov [#allocation3]  }
  0x1b   : > { %629 = vmatprep.subr.mxu0 %v804_v1  ;;  %v328_v14 = vld [vmem:[%s908_s23 + $0x38] sm:$0xff]  ;;  %v327_v15 = vld [vmem:[%s908_s23 + $0x30] sm:$0xff]  ;;  %v326_v16 = vld [vmem:[%s908_s23 + $0x28] sm:$0xff]  ;;  %s730_s9 = sshll.u32 %s806_s15, 4  ;;  %s731_s9 = int_to_ptr.vmem [resolvable:$false] %s730_s9 }
  0x1c   : > { %630 = vmatpush3.msra.mxu0 %v241_v4  ;;  %v325_v17 = vld [vmem:[%s908_s23 + $0x20] sm:$0xff]  ;;  %v324_v18 = vld [vmem:[%s908_s23 + $0x18] sm:$0xff]  ;;  %v323_v19 = vld [vmem:[%s908_s23 + $0x10] sm:$0xff]  ;;  %s732_s10 = scalar_lea.vmem %s731_s9, 256  ;;  %p733_p1 = scmp.lt.s32.totalorder %s963_s29, %s731_s9 }
  0x1d   : > { %632 = vmatmul.mubr.msk.f32.vlgmr.msra.gmra.mxu0 %vm245_vm1, %v240_v5  ;;  %637 = vmatpush3.xpose.msk.msra.mxu1 %vm245_vm1, %v335_v7  ;;  %v322_v20 = vld [vmem:[%s908_s23 + $0x8] sm:$0xff]  ;;  %v321_v21 = vld [vmem:[%s908_s23] sm:$0xff]  ;;  %p734_p2 = scmp.lt.s32.totalorder %s732_s10, %s726_s8 }
  0x1e   : > { %638 = vmatprep.subr.mxu1 %v804_v1 }
  0x1f   : > { %p735_p3 = por %p734_p2, %p733_p1 }
  0x21   : > { %639 = vmatpush3.xpose.msk.msra.mxu1 %vm245_vm1, %v334_v8  ;;  %p736_p5 = pnand %p735_p3, %p729_p0 }
  0x22   : > { %640 = vmatprep.subr.mxu1 %v804_v1 }
  0x25   : > { %641 = vmatpush3.xpose.msk.msra.mxu1 %vm245_vm1, %v333_v9 }
  0x26   : > { %642 = vmatprep.subr.mxu1 %v804_v1 }
  0x29   : > { %643 = vmatpush3.xpose.msk.msra.mxu1 %vm245_vm1, %v332_v10 }
  0x2a   : > { %644 = vmatprep.subr.mxu1 %v804_v1 }
  0x2d   : > { %645 = vmatpush3.xpose.msk.msra.mxu1 %vm245_vm1, %v331_v11 }
  0x2e   : > { %646 = vmatprep.subr.mxu1 %v804_v1 }
  0x31   : > { %647 = vmatpush3.xpose.msk.msra.mxu1 %vm245_vm1, %v330_v12 }
  0x32   : > { %648 = vmatprep.subr.mxu1 %v804_v1 }
  0x35   : > { %649 = vmatpush3.xpose.msk.msra.mxu1 %vm245_vm1, %v329_v13 }
  0x36   : > { %650 = vmatprep.subr.mxu1 %v804_v1 }
  0x39   : > { %651 = vmatpush3.xpose.msk.msra.mxu1 %vm245_vm1, %v328_v14 }
  0x3a   : > { %652 = vmatprep.subr.mxu1 %v804_v1 }
  0x3d   : > { %653 = vmatpush3.xpose.msk.msra.mxu1 %vm245_vm1, %v327_v15 }
  0x3e   : > { %654 = vmatprep.subr.mxu1 %v804_v1 }
  0x41   : > { %655 = vmatpush3.xpose.msk.msra.mxu1 %vm245_vm1, %v326_v16 }
  0x42   : > { %656 = vmatprep.subr.mxu1 %v804_v1 }
  0x45   : > { %657 = vmatpush3.xpose.msk.msra.mxu1 %vm245_vm1, %v325_v17 }
  0x46   : > { %658 = vmatprep.subr.mxu1 %v804_v1 }
  0x49   : > { %659 = vmatpush3.xpose.msk.msra.mxu1 %vm245_vm1, %v324_v18 }
  0x4a   : > { %660 = vmatprep.subr.mxu1 %v804_v1 }
  0x4d   : > { %661 = vmatpush3.xpose.msk.msra.mxu1 %vm245_vm1, %v323_v19 }
  0x4e   : > { %662 = vmatprep.subr.mxu1 %v804_v1 }
  0x51   : > { %663 = vmatpush3.xpose.msk.msra.mxu1 %vm245_vm1, %v322_v20 }
  0x52   : > { %664 = vmatprep.subr.mxu1 %v804_v1 }
  0x55   : > { %665 = vmatpush3.xpose.msk.msra.mxu1 %vm245_vm1, %v321_v21 }
  0xdd   : > { %v315_v22 = vpop.f32.mrf.mxu0 }
  0xde   : > { %319 = vst.msk [vmem:[#allocation2] sm:$0xff] %vm245_vm1, %v315_v22 }
  0xdf   : > { %v633_v23 = vpop.f32.mrf.mxu0 }
  0xe5   : > { %v320_v24 = vld [vmem:[#allocation2] sm:$0xff] }
  0xe6   : > { %667 = vmatmul.mubr.msk.f32.vlgmr.msra.gmra.mxu1 %vm245_vm1, %v320_v24 }
 0x1a6   : > { %v455_v25 = vpop.f32.mrf.mxu1 }
 0x1a7   : > { %459 = vst [vmem:[%s218_s28] sm:$0xff] %v455_v25 }
 0x1a8   : > { %v668_v26 = vpop.f32.mrf.mxu1 }
 0x1a9   : > { %739 = shalt.err (!%p736_p5)
}
 0x1aa   : > { %s740_s11 = scalar_lea.hbm %s968_s6, 128  ;;  %s744_s21 = scalar_lea.hbm %s1015_s3, 256 }
 0x1ab   : > { %p741_p6 = scmp.ne.s32.totalorder %s968_s6, %s740_s11  ;;  %p745_p10 = scmp.lt.s32.totalorder %s968_s6, %s1015_s3 }
 0x1ac   : > { %p746_p11 = scmp.lt.s32.totalorder %s744_s21, %s740_s11 }
 0x1ad   : > { %p742_p7 = pnand %p741_p6, %p867_p4 }
 0x1ae   : > { %p747_p12 = por %p746_p11, %p745_p10 }
 0x1af   : > { %p743_p9 = pneg %p742_p7 }
 0x1b1   : > { %p748_p13 = pnand %p747_p12, %p743_p9 }
 0x1b3   : > { %751 = shalt.err (!%p748_p13)
}
 0x1b4   : > { %669 = dma.vmem_to_hbm [thread:$0]  (%p867_p4), %s963_s29, 128, %s968_s6, %s461_s7  }
 0x1b5 PF: > { %p675_p0 = scmp.ge.s32.totalorder %s802_s17, 2  ;;  %s488_s27 = sand.u32 1, %s782_s12  }
 0x1b6   : > { %s489_s28 = scalar_lea.sflag [#allocation4], %s488_s27 }
 0x1b7   : > { %p672_p1 = pnand %p675_p0, %p874_p8 }
 0x1b9   : > { %p673_p2 = pneg %p672_p1 }
 0x1bb   : > { %777 = dma.done.wait (%p673_p2), %s489_s28, 128  }
 0x1bc   : > { %779 = vsyncadd (%p673_p2), %s489_s28, 4294967168  ;;  %s16_s17 = sadd.s32 1, %s802_s17   ;;  %s1018_s12 = smov %s786_s13 }
 0x1bd   : > { %p13_p3 = scmp.ge.s32.totalorder %s16_s17, 4   ;;  %s1019_s13 = smov %s790_s14 }
 0x1be   : > { %s1020_s14 = smov %s880_s25  ;;  %s1021_s15 = smov %s798_s16 }
 0x1bf   : > { %s1022_s16 = smov %s1024_s20  ;;  %15 = sbr.rel (!%p13_p3) target bundleno = 4 (0x4), region = 74 }
 0x1c4   :  { %494 = vsyncpa [#allocation4], 1 }
 0x1c5   :  { %496 = vsyncpa [#allocation4 + $0x1], 1 }

</bundles_post_ra>
